<compile_context>
chip_gen: v6e
topology: v6e:2x2x1
jax: 0.10.0
libtpu: 0.0.40
codegen_flags: <defaults>
</compile_context>

<pallas_src>
import math

import jax
import jax.numpy as jnp
from jax.experimental import pallas as pl
from jax.experimental.pallas import tpu as pltpu


def _make_positional_embedding(max_len: int, d_model: int) -> jnp.ndarray:
    """bert_pytorch sinusoidal PositionalEmbedding buffer, shape (max_len, d_model)."""
    position = jnp.arange(max_len, dtype=jnp.float32)[:, None]                    # (L, 1)
    div_term = jnp.exp(
        jnp.arange(0, d_model, 2, dtype=jnp.float32) * -(math.log(10000.0) / d_model)
    )                                                                             # (E/2,)
    pe = jnp.zeros((max_len, d_model), dtype=jnp.float32)
    pe = pe.at[:, 0::2].set(jnp.sin(position * div_term))
    pe = pe.at[:, 1::2].set(jnp.cos(position * div_term))
    return pe


def _make_token_table(embed_size: int) -> jnp.ndarray:
    """_token buffer (reference only): eye(E) with an extra all(-1) row -> (E+1, E)."""
    return jnp.concatenate(
        [jnp.eye(embed_size, dtype=jnp.float32),
         -jnp.ones((1, embed_size), dtype=jnp.float32)],
        axis=0,
    )


def bert_embedding_kernel(ids_ref, pe_ref, out_ref):
    """ids: (TB, TS, 1) int32, pe: (S, E) f32 (full slab) -> out: (TB, TS, E) f32.

    Token "lookup" exploits the table structure:
      id in [0, E)  -> one-hot row  (id == lane iota)
      id == E       -> all -1 row   (one-hot is all-zero there, so `onehot - neg1` works)
    Pure VPU work (compares + subtract/add); no MXU, no (B,S,V) intermediate.
    """
    TB, TS, E = out_ref.shape
    # The embed axis must never be tiled for the lane iota / id==E check to be correct.
    assert pe_ref.shape[1] == E, "embed axis must not be tiled"

    # Slice this tile's rows out of the resident positional slab.
    off = pl.multiple_of(pl.program_id(1) * TS, TS)
    pe = pe_ref[pl.ds(off, TS), :]                                        # (TS, E)

    ids = ids_ref[...]                                                    # (TB, TS, 1) int32
    e_iota = jax.lax.broadcasted_iota(jnp.int32, (TB, TS, E), 2)          # lane iota
    onehot = (ids == e_iota).astype(jnp.float32)                          # eye(E) rows (bcast over lanes)
    neg1 = (ids == E).astype(jnp.float32)                                 # (TB, TS, 1) mask for the -1 row
    # Out-of-range ids (<0 or >E) yield an all-zero row here; PyTorch indexing would raise.

    out_ref[...] = (onehot - neg1) + pe[None, :, :]                       # + positional, bcast over batch
    # TODO(synk): nn.Dropout(p=0.1) omitted — eval-mode identity; training-mode dropout
    # would use pltpu.prng_seed + pltpu.prng_random_bits for the mask.


def _round_up(x: int, m: int) -> int:
    return -(-x // m) * m


def _pick_batch_tile(B: int, seq_tile: int, E: int,
                     bytes_per_elem: int = 4,
                     target_tile_bytes: int = 8 << 20) -> int:
    """Largest divisor of B whose output tile is <= target, keeping >=2 batch steps when B>1."""
    per_batch_row = seq_tile * _round_up(E, 128) * bytes_per_elem
    cap = max(1, target_tile_bytes // per_batch_row)
    cap = min(cap, max(1, B // 2))   # leave >=2 leading grid steps for v7x megacore
    best = 1
    for d in range(1, B + 1):
        if B % d == 0 and d <= cap:
            best = d
    return best


def bert_embedding(sequence: jnp.ndarray,
                   pe: jnp.ndarray,
                   *,
                   batch_tile: int | None = None,
                   seq_tile: int | None = None) -> jnp.ndarray:
    """sequence: (B, S) int; pe: (S, E) f32 -> (B, S, E) f32."""
    B, S = sequence.shape
    S_pe, E = pe.shape
    assert S_pe == S, "pe must already be sliced to the sequence length"
    if seq_tile is None:
        seq_tile = S
    assert S % seq_tile == 0
    assert seq_tile == S or seq_tile % 8 == 0, "seq_tile must be S or a multiple of 8"
    if batch_tile is None:
        batch_tile = _pick_batch_tile(B, seq_tile, E)
    assert B % batch_tile == 0

    # Layout plumbing only: ids as (B, S, 1) int32 so batch/seq tiles satisfy the (8,128)
    # block constraints and broadcast cleanly against the lane iota.
    ids3 = sequence.astype(jnp.int32).reshape(B, S, 1)

    grid = (B // batch_tile, S // seq_tile)   # batch leading ("parallel" -> v7x megacore)

    # Explicit VMEM budget (padded sizes, f32):
    #   out tile   : double-buffered
    #   pe slab    : full array, constant block index -> DMA'd once (2 buffers allocated)
    #   ids tile   : double-buffered; lane dim 1 pads to 128 in VMEM
    out_tile_b = 2 * batch_tile * _round_up(seq_tile, 8) * _round_up(E, 128) * 4
    pe_b = 2 * _round_up(S, 8) * _round_up(E, 128) * 4
    ids_tile_b = 2 * batch_tile * _round_up(seq_tile, 8) * 128 * 4
    vmem_needed = out_tile_b + pe_b + ids_tile_b
    # Clamp to 56 MiB so the request stays legal on v7x (64 MiB physical VMEM) while
    # still raising v5e's 16 MiB / v6e's 32 MiB default scoped limits when useful.
    vmem_limit = min(max(32 << 20, int(vmem_needed * 1.25) + (2 << 20)), 56 << 20)

    return pl.pallas_call(
        bert_embedding_kernel,
        out_shape=jax.ShapeDtypeStruct((B, S, E), jnp.float32),
        grid=grid,
        in_specs=[
            # ids tile: tiny int32 block per (batch, seq) grid point.
            pl.BlockSpec((batch_tile, seq_tile, 1), lambda i, j: (i, j, 0)),
            # positional slab: full array, constant block index -> fetched once, held resident.
            pl.BlockSpec((S, E), lambda i, j: (0, 0)),
        ],
        out_specs=pl.BlockSpec((batch_tile, seq_tile, E), lambda i, j: (i, j, 0)),
        compiler_params=pltpu.CompilerParams(
            dimension_semantics=("parallel", "parallel"),
            vmem_limit_bytes=vmem_limit),
    )(ids3, pe)


if __name__ == "__main__":
    # Small shapes consistent with the module's forward.
    embed_size = 32          # E
    B, S = 2, 8              # batch, sequence length
    max_len = 512            # PositionalEmbedding default max_len

    key = jax.random.PRNGKey(0)
    # Token ids index the (embed_size + 1)-row table: valid range [0, embed_size].
    sequence = jax.random.randint(key, (B, S), 0, embed_size + 1, dtype=jnp.int32)

    pe_full = _make_positional_embedding(max_len, embed_size)
    pe = pe_full[:S]                                        # self.pe[:, :x.size(1)]

    out = bert_embedding(sequence, pe)
    out = jax.block_until_ready(out)

    # Pure-JAX reference: _token[sequence] + pe (dropout is identity in eval).
    token_table = _make_token_table(embed_size)             # (E+1, E)
    ref = token_table[sequence] + pe[None, :, :]
    assert out.shape == (B, S, embed_size)
    assert jnp.allclose(out, ref, atol=1e-5), "mismatch vs reference"

    print("KERNEL_OK")
</pallas_src>

<mosaic_0001>
module attributes {stable_mosaic.version = 11 : i64} {
  func.func @bert_embedding_kernel(%arg0: i32, %arg1: i32, %arg2: memref<1x8x1xi32, #tpu.memory_space<vmem>>, %arg3: memref<8x32xf32, #tpu.memory_space<vmem>>, %arg4: memref<1x8x32xf32, #tpu.memory_space<vmem>>) attributes {dimension_semantics = [#tpu.dimension_semantics<parallel>, #tpu.dimension_semantics<parallel>], iteration_bounds = array<i64: 2, 1>, scalar_prefetch = 0 : i64, scratch_operands = 0 : i64, tpu.core_type = #tpu.core_type<tc>, window_params = [{transform_indices = @transform_0, window_bounds = array<i64: 1, 8, 1>}, {pipeline_mode = #tpu.pipeline_mode<synchronous>, transform_indices = @transform_1, window_bounds = array<i64: 8, 32>}, {transform_indices = @transform_2, window_bounds = array<i64: 1, 8, 32>}]} {
    %c8_i32 = arith.constant 8 : i32
    %0 = arith.muli %arg1, %c8_i32 : i32
    %1 = tpu.assume_multiple %0, 8 : i32
    %2 = arith.index_cast %1 : i32 to index
    %c0 = arith.constant 0 : index
    %3 = vector.load %arg3[%2, %c0] : memref<8x32xf32, #tpu.memory_space<vmem>>, vector<8x32xf32>
    %c0_0 = arith.constant 0 : index
    %c0_1 = arith.constant 0 : index
    %c0_2 = arith.constant 0 : index
    %4 = vector.load %arg2[%c0_0, %c0_1, %c0_2] : memref<1x8x1xi32, #tpu.memory_space<vmem>>, vector<1x8x1xi32>
    %5 = tpu.iota {dimensions = array<i32: 2>} : vector<1x8x32xi32>
    %6 = vector.broadcast %4 : vector<1x8x1xi32> to vector<1x8x32xi32>
    %7 = arith.cmpi eq, %6, %5 : vector<1x8x32xi32>
    %8 = arith.extui %7 : vector<1x8x32xi1> to vector<1x8x32xi32>
    %9 = arith.sitofp %8 : vector<1x8x32xi32> to vector<1x8x32xf32>
    %c32_i32 = arith.constant 32 : i32
    %10 = vector.broadcast %c32_i32 : i32 to vector<1x8x1xi32>
    %11 = arith.cmpi eq, %4, %10 : vector<1x8x1xi32>
    %12 = arith.extui %11 : vector<1x8x1xi1> to vector<1x8x1xi32>
    %13 = arith.sitofp %12 : vector<1x8x1xi32> to vector<1x8x1xf32>
    %14 = vector.broadcast %13 : vector<1x8x1xf32> to vector<1x8x32xf32>
    %15 = arith.subf %9, %14 : vector<1x8x32xf32>
    %16 = vector.shape_cast %3 : vector<8x32xf32> to vector<1x8x32xf32>
    %17 = arith.addf %15, %16 : vector<1x8x32xf32>
    %c0_3 = arith.constant 0 : index
    %c0_4 = arith.constant 0 : index
    %c0_5 = arith.constant 0 : index
    %18 = vector.load %arg4[%c0_3, %c0_4, %c0_5] : memref<1x8x32xf32, #tpu.memory_space<vmem>>, vector<1x8x32xf32>
    tpu.vector_store %arg4[%c0_3, %c0_4, %c0_5], %17 {strides = array<i32>} : memref<1x8x32xf32, #tpu.memory_space<vmem>>, vector<1x8x32xf32>,
    return
  }
  func.func @transform_0(%arg0: i32, %arg1: i32) -> (i32, i32, i32) {
    %c0_i32 = arith.constant 0 : i32
    %c0_i32_0 = arith.constant 0 : i32
    return %arg0, %arg1, %c0_i32 : i32, i32, i32
  }
  func.func @transform_1(%arg0: i32, %arg1: i32) -> (i32, i32) {
    %c0_i32 = arith.constant 0 : i32
    %c0_i32_0 = arith.constant 0 : i32
    %c0_i32_1 = arith.constant 0 : i32
    return %c0_i32, %c0_i32_0 : i32, i32
  }
  func.func @transform_2(%arg0: i32, %arg1: i32) -> (i32, i32, i32) {
    %c0_i32 = arith.constant 0 : i32
    %c0_i32_0 = arith.constant 0 : i32
    return %arg0, %arg1, %c0_i32 : i32, i32, i32
  }
}

</mosaic_0001>

<bundles_post_ra>
// kernel: tpu_custom_call.1
= control target key start
LH: loop header
LB: loop body
LE: loop exit
PB: predicated region body
PF: predicated region fallthrough
CT: control target
= control target key end

     0   :  { %7 = vsyncpa [#allocation3], 0  ;;  %s545_s0 = inlined_call_operand.vmem [shape: s32[2,8,1], index: 0, kind: input, shape index: {}]   ;;  %s546_s1 = inlined_call_operand.vmem [shape: f32[8,32], index: 1, kind: input, shape index: {}]   ;;  %s547_s2 = inlined_call_operand.hbm [shape: f32[2,8,32], index: 2, kind: output, shape index: {}]  }
   0x1   :  { %9 = vsyncpa [#allocation3 + $0x1], 0  ;;  %s443_s9 = smov 0   ;;  %s445_s10 = smov 0  }
   0x2   :  { %s447_s11 = smov 0   ;;  %s449_s12 = smov 0  }
   0x3   :  { %s451_s13 = smov 0   ;;  %s453_s14 = smov 0  }
   0x4 LB: > { %s276_s15 = sadd.s32 4294967295, %s423_s14   ;;  %s277_s16 = sadd.s32 4294967294, %s423_s14   ;;  %s423_s14 = sphi %s453_s14, %s15_s14   ;;  %s419_s13 = sphi %s451_s13, %s554_s13   ;;  %s415_s12 = sphi %s449_s12, %s553_s12   ;;  %s411_s11 = sphi %s447_s11, %s552_s11   ;;  %s407_s10 = sphi %s445_s10, %s551_s10   ;;  %s403_s9 = sphi %s443_s9, %s550_s9  }
   0x5   : > { %s27_s17 = sadd.s32 1, %s419_s13  ;;  %s85_s18 = sadd.s32 1, %s411_s11 }
   0x6   : > { %p29_p0 = scmp.ge.s32.totalorder %s27_s17, 2  ;;  %p95_p1 = scmp.ne.s32.totalorder %s411_s11, %s407_s10 }
   0x7   : > { %p96_p2 = scmp.eq.s32.totalorder %s276_s15, 1  ;;  %p101_p3 = scmp.ne.s32.totalorder %s407_s10, %s403_s9 }
   0x8   : > { %s556_s17 = smov (%p29_p0, %s27_s17), 0  ;;  %p102_p5 = scmp.eq.s32.totalorder %s277_s16, 1 }
   0x9   : > { %p483_p4 = por %p96_p2, %p95_p1  ;;  %s80_s20 = ssub.s32 %s419_s13, %s556_s17 }
   0xa   : > { %p280_p6 = scmp.ge.s32.totalorder %s423_s14, 1  ;;  %p83_p7 = scmp.eq.s32.totalorder %s80_s20, 0 }
   0xb   : > { %p490_p8 = por %p102_p5, %p101_p3  ;;  %p133_p9 = scmp.lt.s32.totalorder %s423_s14, 3 }
   0xc   : > { %s496_s22 = scalar_select %p83_p7, %s411_s11, %s85_s18  }
   0xd   : > { %p134_p10 = pnand %p280_p6, %p133_p9 }
   0xe   : > { %p157_p11 = scmp.lt.s32.totalorder (!%p134_p10), %s415_s12, 1  ;;  %s154_s28 = sand.u32 (!%p134_p10), 1, %s407_s10  }
   0xf   : > { %137 = sbr.rel (%p134_p10) target bundleno = 170 (0xaa), region = 28  ;;  %s281_s29 = sshll.u32 (!%p134_p10), %s154_s28, 3 }
  0x10   : > { %s286_s4 = sshll.u32 (!%p134_p10), %s415_s12, 7  ;;  %s156_s5 = scalar_lea.vmem (!%p134_p10), [#allocation2], %s281_s29 }
  0x11   : > { %s203_s6 = sshll.u32 (!%p134_p10), %s156_s5, 4  ;;  %s201_s15 = scalar_lea.hbm (!%p134_p10), %s547_s2, %s286_s4  ;;  %s204_s6 = int_to_ptr.vmem [resolvable:$true] %s203_s6 }
  0x12   : > { %s189_s16 = scalar_lea.sflag (!%p134_p10), [#allocation3], %s154_s28  ;;  %s347_s18 = scalar_lea.vmem (!%p134_p10), %s204_s6, 128 }
  0x13   : > { %p348_p12 = scmp.ne.s32.totalorder (!%p134_p10), %s204_s6, %s347_s18  ;;  %s427_s20 = smov (!%p134_p10), [#allocation2]  }
  0x14   : > { %v425_v0 = vmov 0   ;;  %s158_s23 = scalar_select %p157_p11, %s415_s12, 1  ;;  %v426_v2 = vmov 0.0   ;;  %v168_v4 = vlaneseq  ;;  %v166_v7 = vld [vmem:[%s546_s1] sm:$0xff]  ;;  %vm186_vm2 = vcmask 261120  }
  0x15   : > { %346 = vset.pattern.permute.xlu0 %v425_v0  ;;  %p349_p13 = pnand %p348_p12, %p483_p4 }
  0x16   : > { %s282_s24 = sshll.u32 %s158_s23, 3  ;;  %v169_v5 = vand.u32 127, %v168_v4  ;;  %s351_s23 = sshll.u32 %s427_s20, 4  ;;  %s352_s23 = int_to_ptr.vmem [resolvable:$false] %s351_s23 }
  0x17   : > { %s163_s27 = scalar_lea.vmem %s545_s0, %s282_s24  ;;  %p350_p0 = pneg %p349_p13 }
  0x18   : > { %v167_v1 = vld [vmem:[%s163_s27] sm:$0xff]  ;;  %s353_s12 = scalar_lea.vmem %s352_s23, 256  ;;  %p354_p1 = scmp.lt.s32.totalorder %s204_s6, %s352_s23 }
  0x19   : > { %171 = vperm.xlu0 %346, %v167_v1   ;;  %vm176_vm0 = vcmp.eq.s32.totalorder %v167_v1, 32  ;;  %p355_p2 = scmp.lt.s32.totalorder %s353_s12, %s347_s18 }
  0x1a   : > { %v284_v3 = vsel %vm176_vm0, 1.0, %v426_v2 }
  0x1b   : > { %p356_p3 = por %p355_p2, %p354_p1 }
  0x1d   : > { %181 = vperm.xlu0 %346, %v284_v3   ;;  %p357_p5 = pnand %p356_p3, %p350_p0 }
  0x94   : > { %v172_v6 = vpop.permute.xlu0 %171 }
  0x95   : > { %vm173_vm1 = vcmp.eq.s32.totalorder %v172_v6, %v169_v5 }
  0x96   : > { %v283_v8 = vsel %vm173_vm1, 1.0, %v426_v2 }
  0x98   : > { %v182_v9 = vpop.permute.xlu0 %181 }
  0x99   : > { %v184_v10 = vsub.f32 %v283_v8, %v182_v9 }
  0x9b   : > { %v185_v11 = vadd.f32 %v184_v10, %v166_v7 }
  0x9d   : > { %187 = vst.msk [vmem:[%s156_s5] sm:$0xff] %vm186_vm2, %v185_v11 }
  0x9e   : > { %360 = shalt.err (!%p357_p5)
}
  0x9f   : > { %s361_s24 = scalar_lea.hbm %s201_s15, 128  ;;  %s365_s27 = scalar_lea.hbm %s547_s2, 256 }
  0xa0   : > { %p362_p6 = scmp.ne.s32.totalorder %s201_s15, %s361_s24  ;;  %p366_p10 = scmp.lt.s32.totalorder %s201_s15, %s547_s2 }
  0xa1   : > { %p367_p11 = scmp.lt.s32.totalorder %s365_s27, %s361_s24 }
  0xa2   : > { %p363_p7 = pnand %p362_p6, %p483_p4 }
  0xa3   : > { %p368_p12 = por %p367_p11, %p366_p10 }
  0xa4   : > { %p364_p9 = pneg %p363_p7 }
  0xa6   : > { %p369_p13 = pnand %p368_p12, %p364_p9 }
  0xa8   : > { %372 = shalt.err (!%p369_p13)
}
  0xa9   : > { %289 = dma.vmem_to_hbm [thread:$0]  (%p483_p4), %s204_s6, 128, %s201_s15, %s189_s16  }
  0xaa PF: > { %p295_p0 = scmp.ge.s32.totalorder %s423_s14, 2  ;;  %s215_s30 = sand.u32 1, %s403_s9  }
  0xab   : > { %s216_s3 = scalar_lea.sflag [#allocation3], %s215_s30 }
  0xac   : > { %p292_p1 = pnand %p295_p0, %p490_p8 }
  0xae   : > { %p293_p2 = pneg %p292_p1 }
  0xb0   : > { %398 = dma.done.wait (%p293_p2), %s216_s3, 128  }
  0xb1   : > { %400 = vsyncadd (%p293_p2), %s216_s3, 4294967168  ;;  %s15_s14 = sadd.s32 1, %s423_s14   ;;  %s550_s9 = smov %s407_s10 }
  0xb2   : > { %p12_p3 = scmp.ge.s32.totalorder %s15_s14, 4   ;;  %s551_s10 = smov %s411_s11 }
  0xb3   : > { %s552_s11 = smov %s496_s22  ;;  %s553_s12 = smov %s419_s13 }
  0xb4   : > { %s554_s13 = smov %s556_s17  ;;  %14 = sbr.rel (!%p12_p3) target bundleno = 4 (0x4), region = 64 }
  0xb9   :  { %221 = vsyncpa [#allocation3], 1 }
  0xba   :  { %223 = vsyncpa [#allocation3 + $0x1], 1 }

</bundles_post_ra>
